<compile_context>
chip_gen: v7x
topology: tpu7x:2x2x1
jax: 0.10.0
libtpu: 0.0.40
codegen_flags: <defaults>
</compile_context>

<pallas_src>
import jax
import jax.numpy as jnp
from jax.experimental import pallas as pl
from jax.experimental.pallas import tpu as pltpu


def _round_up(x, m):
    return ((x + m - 1) // m) * m


def _cdiv(a, b):
    return (a + b - 1) // b


def latent_decoder_kernel(x_ref, w1_ref, b1_ref, w2_ref, b2_ref, o_ref):
    # x_ref packs `pack` original latent rows per 128-lane row; the block-diagonal weights
    # make that layout transparent.  StraightThrough forward = round, done in f32.
    x = jnp.round(x_ref[...].astype(jnp.float32))
    # DecoderLayer 1 (div pre-folded into W1p) + shift, then ReLU.
    h = jnp.dot(x, w1_ref[...], preferred_element_type=jnp.float32) + b1_ref[...]
    h = jnp.maximum(h, 0.0)
    # DecoderLayer 2 (output layer) + shift, then final tanh (clamp_weights == 0 -> no clamp).
    y = jnp.dot(h, w2_ref[...], preferred_element_type=jnp.float32) + b2_ref[...]
    # Full-lane (tm/pack, 256) store: no reshape / cross-lane relayout; bf16 writeback.
    o_ref[...] = jnp.tanh(y).astype(o_ref.dtype)


def latent_decoder_forward(weight, div, w1, b1, w2, b2, *, tm=8192,
                           out_dtype=jnp.bfloat16, param_dtype=jnp.float32):
    """weight: (N, latent_dim) latents (keep f32 for exact round()). Returns (N, feature_dim)."""
    N, L = weight.shape
    H = w1.shape[1]
    C = w2.shape[1]
    assert 128 % L == 0, "latent_dim must divide 128 for the lane-dense input packing"
    pack = 128 // L                      # original rows packed per 128-lane row (8 for L=16)
    Hp, Cp = pack * H, pack * C          # packed hidden / output lane widths (256, 256)
    assert Hp % 128 == 0 and Cp % 128 == 0, "packed hidden/output widths must be lane multiples"
    row_align = 8 * pack                 # keeps packed (rows/pack, .) blocks 8-sublane aligned

    # ---- packed parameters (tiny; built once, fully resident in VMEM) ----
    eye = jnp.eye(pack, dtype=jnp.float32)
    # Fold non-trainable div into W1: (x / div) @ W1 == x @ (W1 / div[:, None]).
    w1_eff = w1.astype(jnp.float32) / div.astype(jnp.float32)[:, None]        # (L, H)
    w1_p = jnp.kron(eye, w1_eff).astype(param_dtype)                          # (128, Hp)
    w2_p = jnp.kron(eye, w2.astype(jnp.float32)).astype(param_dtype)          # (Hp, Cp)
    b1_p = jnp.tile(b1.reshape(1, H).astype(jnp.float32), (1, pack)).astype(param_dtype)
    b2_p = jnp.tile(b2.reshape(1, C).astype(jnp.float32), (1, pack)).astype(param_dtype)

    # ---- row tiling: big tiles amortize ~0.35 us/grid-step; keep v7x's 2 TCs fed ----
    tm = max(row_align, min(tm, _round_up(N, row_align)))
    tm = _round_up(tm, row_align)
    MIN_GRID_STEPS = 8   # v7x shards the 'parallel' axis across 2 TensorCores
    cap = max(_round_up(_cdiv(N, MIN_GRID_STEPS), row_align), 8 * row_align)
    tm = min(tm, cap)
    n_pad = _round_up(N, tm)
    # NOTE: if sweeping tm > ~16384 with f32 params, add
    # pltpu.CompilerParams(vmem_limit_bytes=...) headroom (v5e default scoped VMEM is 16 MiB).

    if n_pad != N:
        # Padded rows are zeros; they compute harmless values that are sliced off below.
        weight = jnp.pad(weight, ((0, n_pad - N), (0, 0)))
    # Lane-dense input: (n_pad, L) -> (n_pad/pack, 128); identical row-major bytes.
    weight_packed = weight.reshape(n_pad // pack, 128)

    out_packed = pl.pallas_call(
        latent_decoder_kernel,
        out_shape=jax.ShapeDtypeStruct((n_pad // pack, Cp), out_dtype),
        grid_spec=pltpu.PrefetchScalarGridSpec(
            num_scalar_prefetch=0,
            grid=(n_pad // tm,),
            in_specs=[
                pl.BlockSpec((tm // pack, 128), lambda i: (i, 0)),   # streamed packed latents
                pl.BlockSpec((pack * L, Hp), lambda i: (0, 0)),      # W1p  (resident)
                pl.BlockSpec((1, Hp), lambda i: (0, 0)),             # b1p  (resident)
                pl.BlockSpec((Hp, Cp), lambda i: (0, 0)),            # W2p  (resident)
                pl.BlockSpec((1, Cp), lambda i: (0, 0)),             # b2p  (resident)
            ],
            out_specs=pl.BlockSpec((tm // pack, Cp), lambda i: (i, 0)),
        ),
        compiler_params=pltpu.CompilerParams(
            dimension_semantics=("parallel",),
        ),
    )(weight_packed, w1_p, b1_p, w2_p, b2_p)

    # (n_pad/pack, Cp) has identical row-major bytes to (n_pad, C); free reshape + slice.
    return out_packed.reshape(n_pad, C)[:N]


def reference_forward(weight, div, w1, b1, w2, b2):
    x = jnp.round(weight) / div[None, :]
    h = jnp.maximum(x @ w1 + b1, 0.0)
    y = h @ w2 + b2
    return jnp.tanh(y)


if __name__ == "__main__":
    # Small demo shapes: N points, latent_dim -> hidden_dim -> feature_dim.
    N, LATENT, HIDDEN, FEAT = 512, 16, 32, 32
    key = jax.random.PRNGKey(0)
    k_x, k_w1, k_w2 = jax.random.split(key, 3)

    # f32 latents (the StraightThrough round() happens in f32 inside the kernel).
    weight = jax.random.normal(k_x, (N, LATENT), dtype=jnp.float32) * 3.0

    # Parameters, mirroring reset_parameters('normal', ldec_std=1.0):
    #   scale ~ Normal(0, 1), shift = zeros, div = ones (non-trainable, latent_norm='none').
    div = jnp.ones((LATENT,), dtype=jnp.float32)
    w1 = jax.random.normal(k_w1, (LATENT, HIDDEN), dtype=jnp.float32)
    b1 = jnp.zeros((1, HIDDEN), dtype=jnp.float32)
    w2 = jax.random.normal(k_w2, (HIDDEN, FEAT), dtype=jnp.float32)
    b2 = jnp.zeros((1, FEAT), dtype=jnp.float32)

    out = jax.block_until_ready(latent_decoder_forward(weight, div, w1, b1, w2, b2))

    ref = reference_forward(weight, div, w1, b1, w2, b2)
    assert out.shape == (N, FEAT)
    assert jnp.allclose(out.astype(jnp.float32), ref, atol=1e-2, rtol=1e-2), "mismatch vs reference"

    print("KERNEL_OK")
</pallas_src>

<mosaic_0001>
module attributes {stable_mosaic.version = 11 : i64} {
  func.func @latent_decoder_kernel(%arg0: i32, %arg1: memref<64x128xf32, #tpu.memory_space<vmem>>, %arg2: memref<128x256xf32, #tpu.memory_space<vmem>>, %arg3: memref<1x256xf32, #tpu.memory_space<vmem>>, %arg4: memref<256x256xf32, #tpu.memory_space<vmem>>, %arg5: memref<1x256xf32, #tpu.memory_space<vmem>>, %arg6: memref<64x256xbf16, #tpu.memory_space<vmem>>) attributes {dimension_semantics = [#tpu.dimension_semantics<parallel>], iteration_bounds = array<i64: 1>, scalar_prefetch = 0 : i64, scratch_operands = 0 : i64, tpu.core_type = #tpu.core_type<tc>, window_params = [{transform_indices = @transform_0, window_bounds = array<i64: 64, 128>}, {pipeline_mode = #tpu.pipeline_mode<synchronous>, transform_indices = @transform_1, window_bounds = array<i64: 128, 256>}, {pipeline_mode = #tpu.pipeline_mode<synchronous>, transform_indices = @transform_2, window_bounds = array<i64: 1, 256>}, {pipeline_mode = #tpu.pipeline_mode<synchronous>, transform_indices = @transform_3, window_bounds = array<i64: 256, 256>}, {pipeline_mode = #tpu.pipeline_mode<synchronous>, transform_indices = @transform_4, window_bounds = array<i64: 1, 256>}, {transform_indices = @transform_5, window_bounds = array<i64: 64, 256>}]} {
    %c0 = arith.constant 0 : index
    %c0_0 = arith.constant 0 : index
    %0 = vector.load %arg1[%c0, %c0_0] : memref<64x128xf32, #tpu.memory_space<vmem>>, vector<64x128xf32>
    %1 = math.roundeven %0 : vector<64x128xf32>
    %c0_1 = arith.constant 0 : index
    %c0_2 = arith.constant 0 : index
    %2 = vector.load %arg2[%c0_1, %c0_2] : memref<128x256xf32, #tpu.memory_space<vmem>>, vector<128x256xf32>
    %cst = arith.constant dense<0.000000e+00> : vector<64x256xf32>
    %3 = tpu.matmul %1, %2, %cst {dimension_numbers = #tpu.dot_dimension_numbers<[1], [0], [0], [1], [0, 0, 1, 1], [], []>} : vector<64x128xf32>, vector<128x256xf32>, vector<64x256xf32> -> vector<64x256xf32>
    %c0_3 = arith.constant 0 : index
    %c0_4 = arith.constant 0 : index
    %4 = vector.load %arg3[%c0_3, %c0_4] : memref<1x256xf32, #tpu.memory_space<vmem>>, vector<1x256xf32>
    %5 = vector.broadcast %4 : vector<1x256xf32> to vector<64x256xf32>
    %6 = arith.addf %3, %5 : vector<64x256xf32>
    %cst_5 = arith.constant 0.000000e+00 : f32
    %7 = vector.broadcast %cst_5 : f32 to vector<64x256xf32>
    %8 = arith.maximumf %6, %7 : vector<64x256xf32>
    %c0_6 = arith.constant 0 : index
    %c0_7 = arith.constant 0 : index
    %9 = vector.load %arg4[%c0_6, %c0_7] : memref<256x256xf32, #tpu.memory_space<vmem>>, vector<256x256xf32>
    %cst_8 = arith.constant dense<0.000000e+00> : vector<64x256xf32>
    %10 = tpu.matmul %8, %9, %cst_8 {dimension_numbers = #tpu.dot_dimension_numbers<[1], [0], [0], [1], [0, 0, 1, 1], [], []>} : vector<64x256xf32>, vector<256x256xf32>, vector<64x256xf32> -> vector<64x256xf32>
    %c0_9 = arith.constant 0 : index
    %c0_10 = arith.constant 0 : index
    %11 = vector.load %arg5[%c0_9, %c0_10] : memref<1x256xf32, #tpu.memory_space<vmem>>, vector<1x256xf32>
    %12 = vector.broadcast %11 : vector<1x256xf32> to vector<64x256xf32>
    %13 = arith.addf %10, %12 : vector<64x256xf32>
    %14 = math.tanh %13 : vector<64x256xf32>
    %15 = arith.truncf %14 : vector<64x256xf32> to vector<64x256xbf16>
    %c0_11 = arith.constant 0 : index
    %c0_12 = arith.constant 0 : index
    %16 = vector.load %arg6[%c0_11, %c0_12] : memref<64x256xbf16, #tpu.memory_space<vmem>>, vector<64x256xbf16>
    tpu.vector_store %arg6[%c0_11, %c0_12], %15 {strides = array<i32>} : memref<64x256xbf16, #tpu.memory_space<vmem>>, vector<64x256xbf16>,
    return
  }
  func.func @transform_0(%arg0: i32) -> (i32, i32) {
    %c0_i32 = arith.constant 0 : i32
    %c0_i32_0 = arith.constant 0 : i32
    return %arg0, %c0_i32 : i32, i32
  }
  func.func @transform_1(%arg0: i32) -> (i32, i32) {
    %c0_i32 = arith.constant 0 : i32
    %c0_i32_0 = arith.constant 0 : i32
    %c0_i32_1 = arith.constant 0 : i32
    return %c0_i32, %c0_i32_0 : i32, i32
  }
  func.func @transform_2(%arg0: i32) -> (i32, i32) {
    %c0_i32 = arith.constant 0 : i32
    %c0_i32_0 = arith.constant 0 : i32
    %c0_i32_1 = arith.constant 0 : i32
    return %c0_i32, %c0_i32_0 : i32, i32
  }
  func.func @transform_3(%arg0: i32) -> (i32, i32) {
    %c0_i32 = arith.constant 0 : i32
    %c0_i32_0 = arith.constant 0 : i32
    %c0_i32_1 = arith.constant 0 : i32
    return %c0_i32, %c0_i32_0 : i32, i32
  }
  func.func @transform_4(%arg0: i32) -> (i32, i32) {
    %c0_i32 = arith.constant 0 : i32
    %c0_i32_0 = arith.constant 0 : i32
    %c0_i32_1 = arith.constant 0 : i32
    return %c0_i32, %c0_i32_0 : i32, i32
  }
  func.func @transform_5(%arg0: i32) -> (i32, i32) {
    %c0_i32 = arith.constant 0 : i32
    %c0_i32_0 = arith.constant 0 : i32
    return %arg0, %c0_i32 : i32, i32
  }
}

</mosaic_0001>

<bundles_post_ra>
// kernel: tpu_custom_call.1
= control target key start
LH: loop header
LB: loop body
LE: loop exit
PB: predicated region body
PF: predicated region fallthrough
CT: control target
= control target key end

     0   :  { %10 = vsyncpa [#allocation3], 0  ;;  %s920_s0 = inlined_call_operand.hbm [shape: f32[64,128], index: 0, kind: input, shape index: {}]   ;;  %s921_s1 = inlined_call_operand.hbm [shape: f32[128,256], index: 1, kind: input, shape index: {}]   ;;  %s922_s2 = inlined_call_operand.vmem [shape: f32[1,256], index: 2, kind: input, shape index: {}]   ;;  %s923_s3 = inlined_call_operand.hbm [shape: f32[256,256], index: 3, kind: input, shape index: {}]   ;;  %s924_s4 = inlined_call_operand.vmem [shape: f32[1,256], index: 4, kind: input, shape index: {}]   ;;  %s925_s5 = inlined_call_operand.hbm [shape: bf16[64,256], index: 5, kind: output, shape index: {}]  }
   0x1   :  { %11 = vsyncpa [#allocation6], 0 }
   0x2   :  { %12 = vsyncpa [#allocation4], 0  ;;  %s785_s18 = smov [#allocation5]   ;;  %s691_s22 = scalar_lea.hbm %s921_s1, 4096 }
   0x3   :  { %s30_s19 = sshll.u32 %s785_s18, 4  ;;  %p692_p0 = scmp.ne.s32.totalorder %s921_s1, %s691_s22  ;;  %s31_s19 = int_to_ptr.vmem [resolvable:$true] %s30_s19 }
   0x4   :  { %p695_p1 = scmp.lt.u32.totalorder %s691_s22, %s921_s1 }
   0x6   :  { %p697_p2 = pnand %p695_p1, %p692_p0 }
   0x8   :  { %700 = shalt.err (!%p697_p2)
}
   0x9   :  { %s701_s27 = scalar_lea.vmem %s31_s19, 4096  ;;  %p706_p4 = scmp.lt.s32.totalorder %s31_s19, %s31_s19 }
   0xa   :  { %p702_p3 = scmp.ne.s32.totalorder %s31_s19, %s701_s27  ;;  %p707_p5 = scmp.lt.s32.totalorder %s701_s27, %s701_s27 }
   0xc   :  { %p708_p6 = por %p707_p5, %p706_p4 }
   0xe   :  { %p709_p7 = pnand %p708_p6, %p702_p3 }
  0x10   :  { %712 = shalt.err (!%p709_p7)
}
  0x11   :  { %s786_s28 = smov 256   ;;  %s787_s29 = smov 16  }
  0x12   :  { %36 = dma.hbm_to_vmem [thread:$0]  %s921_s1, 4096, %s31_s19, [#allocation6], %s786_s28, %s786_s28, %s787_s29  }
  0x13   :  { %s788_s7 = smov [#allocation2]   ;;  %s713_s11 = scalar_lea.hbm %s920_s0, 1024 }
  0x14   :  { %s18_s8 = sshll.u32 %s788_s7, 4  ;;  %p714_p8 = scmp.ne.s32.totalorder %s920_s0, %s713_s11  ;;  %s19_s8 = int_to_ptr.vmem [resolvable:$true] %s18_s8 }
  0x15   :  { %p717_p9 = scmp.lt.u32.totalorder %s713_s11, %s920_s0 }
  0x17   :  { %p719_p10 = pnand %p717_p9, %p714_p8 }
  0x19   :  { %722 = shalt.err (!%p719_p10)
}
  0x1a   :  { %s723_s16 = scalar_lea.vmem %s19_s8, 1024  ;;  %p728_p12 = scmp.lt.s32.totalorder %s19_s8, %s19_s8 }
  0x1b   :  { %p724_p11 = scmp.ne.s32.totalorder %s19_s8, %s723_s16  ;;  %p729_p13 = scmp.lt.s32.totalorder %s723_s16, %s723_s16 }
  0x1d   :  { %p730_p0 = por %p729_p13, %p728_p12 }
  0x1f   :  { %p731_p1 = pnand %p730_p0, %p724_p11 }
  0x21   :  { %734 = shalt.err (!%p731_p1)
}
  0x22   :  { %s789_s1 = smov 128   ;;  %s790_s17 = smov 8  }
  0x23   :  { %24 = dma.hbm_to_vmem [thread:$0]  %s920_s0, 1024, %s19_s8, [#allocation3], %s789_s1, %s789_s1, %s790_s17  }
  0x24   :  { %s791_s20 = smov [#allocation7]   ;;  %s735_s24 = scalar_lea.hbm %s923_s3, 8192 }
  0x25   :  { %s44_s21 = sshll.u32 %s791_s20, 4  ;;  %p736_p2 = scmp.ne.s32.totalorder %s923_s3, %s735_s24  ;;  %s45_s21 = int_to_ptr.vmem [resolvable:$true] %s44_s21 }
  0x26   :  { %p739_p3 = scmp.lt.u32.totalorder %s735_s24, %s923_s3 }
  0x28   :  { %p741_p4 = pnand %p739_p3, %p736_p2 }
  0x2a   :  { %744 = shalt.err (!%p741_p4)
}
  0x2b   :  { %s745_s6 = scalar_lea.vmem %s45_s21, 8192  ;;  %p750_p6 = scmp.lt.s32.totalorder %s45_s21, %s45_s21 }
  0x2c   :  { %p746_p5 = scmp.ne.s32.totalorder %s45_s21, %s745_s6  ;;  %p751_p7 = scmp.lt.s32.totalorder %s745_s6, %s745_s6 }
  0x2e   :  { %p752_p8 = por %p751_p7, %p750_p6 }
  0x30   :  { %p753_p9 = pnand %p752_p8, %p746_p5 }
  0x32   :  { %756 = shalt.err (!%p753_p9)
}
  0x33   :  { %50 = dma.hbm_to_vmem [thread:$0]  %s923_s3, 8192, %s45_s21, [#allocation6], %s786_s28, %s786_s28, %s787_s29  }
  0x34   :  { %779 = dma.done.wait [#allocation3], 1024  }
  0x35   :  { %780 = vsyncadd [#allocation3], 4294966272 }
  0x36   :  { %781 = dma.done.wait [#allocation6], 12288  }
  0x37   :  { %782 = vsyncadd [#allocation6], 4294955008  ;;  %v792_v0 = vmov 0.0   ;;  %v79_v1 = vld [vmem:[#allocation5 + $0x8] sm:$0xff]  ;;  %v81_v2 = vld [vmem:[#allocation5 + $0x18] sm:$0xff] }
  0x38   :  { %186 = vmatprep.mubr.f32.mxu0 %v792_v0  ;;  %v78_v3 = vld [vmem:[#allocation5] sm:$0xff]  ;;  %v546_v4 = vpack.c.bf16 %v81_v2, %v79_v1  ;;  %v80_v5 = vld [vmem:[#allocation5 + $0x10] sm:$0xff]  ;;  %v83_v6 = vld [vmem:[#allocation5 + $0x28] sm:$0xff] }
  0x39   :  { %v85_v7 = vld [vmem:[#allocation5 + $0x38] sm:$0xff]  ;;  %v548_v8 = vpack.c.bf16 %v80_v5, %v78_v3  ;;  %v82_v10 = vld [vmem:[#allocation5 + $0x20] sm:$0xff]  ;;  %v84_v11 = vld [vmem:[#allocation5 + $0x30] sm:$0xff] }
  0x3a   :  { %v550_v9 = vpack.c.bf16 %v85_v7, %v83_v6  ;;  %v87_v12 = vld [vmem:[#allocation5 + $0x48] sm:$0xff]  ;;  %547 = vmatprep.subr.bf16.mxu0 %v546_v4  ;;  %v89_v13 = vld [vmem:[#allocation5 + $0x58] sm:$0xff]  ;;  %v552_v14 = vpack.c.bf16 %v84_v11, %v82_v10  ;;  %v86_v16 = vld [vmem:[#allocation5 + $0x40] sm:$0xff] }
  0x3b   :  { %549 = vmatpush1.bf16.msra.mxu0 %v548_v8  ;;  %v554_v15 = vpack.c.bf16 %v89_v13, %v87_v12  ;;  %v88_v17 = vld [vmem:[#allocation5 + $0x50] sm:$0xff]  ;;  %v91_v18 = vld [vmem:[#allocation5 + $0x68] sm:$0xff]  ;;  %v93_v19 = vld [vmem:[#allocation5 + $0x78] sm:$0xff] }
  0x3c   :  { %551 = vmatprep.subr.bf16.mxu0 %v550_v9  ;;  %v556_v20 = vpack.c.bf16 %v88_v17, %v86_v16  ;;  %v558_v21 = vpack.c.bf16 %v93_v19, %v91_v18  ;;  %v90_v22 = vld [vmem:[#allocation5 + $0x60] sm:$0xff]  ;;  %v92_v23 = vld [vmem:[#allocation5 + $0x70] sm:$0xff]  ;;  %v95_v24 = vld [vmem:[#allocation5 + $0x88] sm:$0xff] }
  0x3d   :  { %v97_v25 = vld [vmem:[#allocation5 + $0x98] sm:$0xff]  ;;  %v560_v26 = vpack.c.bf16 %v92_v23, %v90_v22  ;;  %v94_v27 = vld [vmem:[#allocation5 + $0x80] sm:$0xff]  ;;  %v96_v28 = vld [vmem:[#allocation5 + $0x90] sm:$0xff] }
  0x3e   :  { %v99_v29 = vld [vmem:[#allocation5 + $0xa8] sm:$0xff]  ;;  %v562_v30 = vpack.c.bf16 %v97_v25, %v95_v24  ;;  %v101_v31 = vld [vmem:[#allocation5 + $0xb8] sm:$0xff]  ;;  %v251_v35 = vld [vmem:[#allocation7] sm:$0xff]  ;;  %v564_v42 = vpack.c.bf16 %v96_v28, %v94_v27 }
  0x3f   :  { %553 = vmatpush1.bf16.msra.mxu0 %v552_v14  ;;  %v252_v32 = vld [vmem:[#allocation7 + $0x8] sm:$0xff]  ;;  %v254_v33 = vld [vmem:[#allocation7 + $0x18] sm:$0xff]  ;;  %v253_v36 = vld [vmem:[#allocation7 + $0x10] sm:$0xff]  ;;  %v566_v46 = vpack.c.bf16 %v101_v31, %v99_v29 }
  0x40   :  { %555 = vmatprep.subr.bf16.mxu0 %v554_v15  ;;  %v578_v34 = vpack.c.bf16 %v254_v33, %v252_v32  ;;  %v256_v37 = vld [vmem:[#allocation7 + $0x28] sm:$0xff]  ;;  %v580_v38 = vpack.c.bf16 %v253_v36, %v251_v35  ;;  %v258_v39 = vld [vmem:[#allocation7 + $0x38] sm:$0xff]  ;;  %v255_v40 = vld [vmem:[#allocation7 + $0x20] sm:$0xff] }
  0x41   :  { %v257_v41 = vld [vmem:[#allocation7 + $0x30] sm:$0xff]  ;;  %v582_v43 = vpack.c.bf16 %v258_v39, %v256_v37  ;;  %v260_v44 = vld [vmem:[#allocation7 + $0x48] sm:$0xff]  ;;  %v262_v45 = vld [vmem:[#allocation7 + $0x58] sm:$0xff] }
  0x42   :  { %579 = vmatprep.subr.bf16.mxu1 %v578_v34  ;;  %v98_v47 = vld [vmem:[#allocation5 + $0xa0] sm:$0xff]  ;;  %v100_v48 = vld [vmem:[#allocation5 + $0xb0] sm:$0xff]  ;;  %v103_v49 = vld [vmem:[#allocation5 + $0xc8] sm:$0xff]  ;;  %v584_v50 = vpack.c.bf16 %v257_v41, %v255_v40  ;;  %v586_v52 = vpack.c.bf16 %v262_v45, %v260_v44 }
  0x43   :  { %557 = vmatpush1.bf16.msra.mxu0 %v556_v20  ;;  %581 = vmatpush1.bf16.msra.mxu1 %v580_v38  ;;  %v105_v51 = vld [vmem:[#allocation5 + $0xd8] sm:$0xff]  ;;  %v259_v53 = vld [vmem:[#allocation7 + $0x40] sm:$0xff]  ;;  %v261_v54 = vld [vmem:[#allocation7 + $0x50] sm:$0xff]  ;;  %v568_v57 = vpack.c.bf16 %v100_v48, %v98_v47 }
  0x44   :  { %559 = vmatprep.subr.bf16.mxu0 %v558_v21  ;;  %583 = vmatprep.subr.bf16.mxu1 %v582_v43  ;;  %v264_v55 = vld [vmem:[#allocation7 + $0x68] sm:$0xff]  ;;  %v266_v56 = vld [vmem:[#allocation7 + $0x78] sm:$0xff]  ;;  %v570_v58 = vpack.c.bf16 %v105_v51, %v103_v49  ;;  %v102_v59 = vld [vmem:[#allocation5 + $0xc0] sm:$0xff]  ;;  %v588_v62 = vpack.c.bf16 %v261_v54, %v259_v53 }
  0x45   :  { %v104_v60 = vld [vmem:[#allocation5 + $0xd0] sm:$0xff]  ;;  %v107_v61 = vld [vmem:[#allocation5 + $0xe8] sm:$0xff]  ;;  %v109_v63 = vld [vmem:[#allocation5 + $0xf8] sm:$0xff]  ;;  %v590_v1 = vpack.c.bf16 %v266_v56, %v264_v55 }
  0x46   :  { %v263_v2 = vld [vmem:[#allocation7 + $0x60] sm:$0xff]  ;;  %v265_v3 = vld [vmem:[#allocation7 + $0x70] sm:$0xff]  ;;  %v268_v4 = vld [vmem:[#allocation7 + $0x88] sm:$0xff]  ;;  %v572_v6 = vpack.c.bf16 %v104_v60, %v102_v59  ;;  %v574_v7 = vpack.c.bf16 %v109_v63, %v107_v61 }
  0x47   :  { %561 = vmatpush1.bf16.msra.mxu0 %v560_v26  ;;  %585 = vmatpush1.bf16.msra.mxu1 %v584_v50  ;;  %v270_v5 = vld [vmem:[#allocation7 + $0x98] sm:$0xff]  ;;  %v106_v8 = vld [vmem:[#allocation5 + $0xe0] sm:$0xff]  ;;  %v108_v9 = vld [vmem:[#allocation5 + $0xf0] sm:$0xff]  ;;  %v592_v10 = vpack.c.bf16 %v265_v3, %v263_v2 }
  0x48   :  { %563 = vmatprep.subr.bf16.mxu0 %v562_v30  ;;  %587 = vmatprep.subr.bf16.mxu1 %v586_v52  ;;  %v594_v11 = vpack.c.bf16 %v270_v5, %v268_v4  ;;  %v267_v12 = vld [vmem:[#allocation7 + $0x80] sm:$0xff]  ;;  %v269_v13 = vld [vmem:[#allocation7 + $0x90] sm:$0xff]  ;;  %v272_v14 = vld [vmem:[#allocation7 + $0xa8] sm:$0xff]  ;;  %v576_v16 = vpack.c.bf16 %v108_v9, %v106_v8 }
  0x49   :  { %v274_v15 = vld [vmem:[#allocation7 + $0xb8] sm:$0xff]  ;;  %v62_v17 = vld [vmem:[#allocation2] sm:$0xff]  ;;  %v596_v18 = vpack.c.bf16 %v269_v13, %v267_v12  ;;  %v273_v21 = vld [vmem:[#allocation7 + $0xb0] sm:$0xff] }
  0x4a   :  { %v598_v19 = vpack.c.bf16 %v274_v15, %v272_v14  ;;  %v271_v20 = vld [vmem:[#allocation7 + $0xa0] sm:$0xff]  ;;  %v642_v22 = vround.rtne.f32 %v62_v17  ;;  %v276_v23 = vld [vmem:[#allocation7 + $0xc8] sm:$0xff]  ;;  %v278_v24 = vld [vmem:[#allocation7 + $0xd8] sm:$0xff] }
  0x4b   :  { %565 = vmatpush1.bf16.msra.mxu0 %v564_v42  ;;  %589 = vmatpush1.bf16.msra.mxu1 %v588_v62  ;;  %v63_v25 = vld [vmem:[#allocation2 + $0x8] sm:$0xff]  ;;  %v600_v26 = vpack.c.bf16 %v273_v21, %v271_v20  ;;  %v602_v27 = vpack.c.bf16 %v278_v24, %v276_v23  ;;  %v275_v28 = vld [vmem:[#allocation7 + $0xc0] sm:$0xff]  ;;  %v277_v29 = vld [vmem:[#allocation7 + $0xd0] sm:$0xff] }
  0x4c   :  { %567 = vmatprep.subr.bf16.mxu0 %v566_v46  ;;  %591 = vmatprep.subr.bf16.mxu1 %v590_v1  ;;  %v643_v30 = vround.rtne.f32 %v63_v25  ;;  %v280_v31 = vld [vmem:[#allocation7 + $0xe8] sm:$0xff]  ;;  %v282_v32 = vld [vmem:[#allocation7 + $0xf8] sm:$0xff]  ;;  %v64_v33 = vld [vmem:[#allocation2 + $0x10] sm:$0xff]  ;;  %v604_v34 = vpack.c.bf16 %v277_v29, %v275_v28 }
  0x4d   :  { %v606_v35 = vpack.c.bf16 %v282_v32, %v280_v31  ;;  %v279_v36 = vld [vmem:[#allocation7 + $0xe0] sm:$0xff]  ;;  %v281_v37 = vld [vmem:[#allocation7 + $0xf0] sm:$0xff]  ;;  %v644_v38 = vround.rtne.f32 %v64_v33  ;;  %v284_v39 = vld [vmem:[#allocation7 + $0x108] sm:$0xff] }
  0x4e   :  { %v286_v40 = vld [vmem:[#allocation7 + $0x118] sm:$0xff]  ;;  %v608_v42 = vpack.c.bf16 %v281_v37, %v279_v36  ;;  %v283_v44 = vld [vmem:[#allocation7 + $0x100] sm:$0xff]  ;;  %v285_v45 = vld [vmem:[#allocation7 + $0x110] sm:$0xff] }
  0x4f   :  { %569 = vmatpush1.bf16.msra.mxu0 %v568_v57  ;;  %593 = vmatpush1.bf16.msra.mxu1 %v592_v10  ;;  %v65_v41 = vld [vmem:[#allocation2 + $0x18] sm:$0xff]  ;;  %v610_v43 = vpack.c.bf16 %v286_v40, %v284_v39  ;;  %v288_v47 = vld [vmem:[#allocation7 + $0x128] sm:$0xff]  ;;  %v66_v49 = vld [vmem:[#allocation2 + $0x20] sm:$0xff]  ;;  %v612_v50 = vpack.c.bf16 %v285_v45, %v283_v44 }
  0x50   :  { %571 = vmatprep.subr.bf16.mxu0 %v570_v58  ;;  %595 = vmatprep.subr.bf16.mxu1 %v594_v11  ;;  %v645_v46 = vround.rtne.f32 %v65_v41  ;;  %v290_v48 = vld [vmem:[#allocation7 + $0x138] sm:$0xff]  ;;  %v287_v52 = vld [vmem:[#allocation7 + $0x120] sm:$0xff]  ;;  %v289_v53 = vld [vmem:[#allocation7 + $0x130] sm:$0xff]  ;;  %v646_v54 = vround.rtne.f32 %v66_v49 }
  0x51   :  { %v614_v51 = vpack.c.bf16 %v290_v48, %v288_v47  ;;  %v292_v55 = vld [vmem:[#allocation7 + $0x148] sm:$0xff]  ;;  %v294_v56 = vld [vmem:[#allocation7 + $0x158] sm:$0xff]  ;;  %v616_v58 = vpack.c.bf16 %v289_v53, %v287_v52  ;;  %v291_v60 = vld [vmem:[#allocation7 + $0x140] sm:$0xff] }
  0x52   :  { %v67_v57 = vld [vmem:[#allocation2 + $0x28] sm:$0xff]  ;;  %v618_v59 = vpack.c.bf16 %v294_v56, %v292_v55  ;;  %v293_v61 = vld [vmem:[#allocation7 + $0x150] sm:$0xff]  ;;  %v298_v1 = vld [vmem:[#allocation7 + $0x178] sm:$0xff] }
  0x53   :  { %573 = vmatpush1.bf16.msra.mxu0 %v572_v6  ;;  %597 = vmatpush1.bf16.msra.mxu1 %v596_v18  ;;  %v647_v62 = vround.rtne.f32 %v67_v57  ;;  %v296_v63 = vld [vmem:[#allocation7 + $0x168] sm:$0xff]  ;;  %v68_v2 = vld [vmem:[#allocation2 + $0x30] sm:$0xff]  ;;  %v620_v3 = vpack.c.bf16 %v293_v61, %v291_v60  ;;  %v295_v5 = vld [vmem:[#allocation7 + $0x160] sm:$0xff] }
  0x54   :  { %575 = vmatprep.subr.bf16.mxu0 %v574_v7  ;;  %599 = vmatprep.subr.bf16.mxu1 %v598_v19  ;;  %v622_v4 = vpack.c.bf16 %v298_v1, %v296_v63  ;;  %v297_v6 = vld [vmem:[#allocation7 + $0x170] sm:$0xff]  ;;  %v648_v7 = vround.rtne.f32 %v68_v2  ;;  %v300_v8 = vld [vmem:[#allocation7 + $0x188] sm:$0xff]  ;;  %v302_v9 = vld [vmem:[#allocation7 + $0x198] sm:$0xff] }
  0x55   :  { %v69_v10 = vld [vmem:[#allocation2 + $0x38] sm:$0xff]  ;;  %v624_v11 = vpack.c.bf16 %v297_v6, %v295_v5  ;;  %v626_v12 = vpack.c.bf16 %v302_v9, %v300_v8  ;;  %v299_v13 = vld [vmem:[#allocation7 + $0x180] sm:$0xff]  ;;  %v301_v14 = vld [vmem:[#allocation7 + $0x190] sm:$0xff] }
  0x56   :  { %v649_v15 = vround.rtne.f32 %v69_v10  ;;  %v306_v17 = vld [vmem:[#allocation7 + $0x1b8] sm:$0xff]  ;;  %v628_v18 = vpack.c.bf16 %v301_v14, %v299_v13  ;;  %v303_v20 = vld [vmem:[#allocation7 + $0x1a0] sm:$0xff]  ;;  %v305_v21 = vld [vmem:[#allocation7 + $0x1b0] sm:$0xff] }
  0x57   :  { %577 = vmatpush1.bf16.msra.mxu0 %v576_v16  ;;  %601 = vmatpush1.bf16.msra.mxu1 %v600_v26  ;;  %v304_v16 = vld [vmem:[#allocation7 + $0x1a8] sm:$0xff]  ;;  %v310_v23 = vld [vmem:[#allocation7 + $0x1d8] sm:$0xff]  ;;  %v632_v24 = vpack.c.bf16 %v305_v21, %v303_v20  ;;  %v307_v26 = vld [vmem:[#allocation7 + $0x1c0] sm:$0xff] }
  0x58   :  { %603 = vmatprep.subr.bf16.mxu1 %v602_v27  ;;  %v630_v19 = vpack.c.bf16 %v306_v17, %v304_v16  ;;  %v309_v27 = vld [vmem:[#allocation7 + $0x1d0] sm:$0xff]  ;;  %v314_v29 = vld [vmem:[#allocation7 + $0x1f8] sm:$0xff]  ;;  %v311_v31 = vld [vmem:[#allocation7 + $0x1e0] sm:$0xff] }
  0x59   :  { %v636_v28 = vpack.c.bf16 %v309_v27, %v307_v26  ;;  %v313_v32 = vld [vmem:[#allocation7 + $0x1f0] sm:$0xff]  ;;  %v110_v37 = vld [vmem:[%s922_s2] sm:$0x3] }
  0x5a   :  { %187 = vmatmul.mubr.f32.vlgmr.msra.gmra.mrb[0].mxu0 %v642_v22  ;;  %v308_v22 = vld [vmem:[#allocation7 + $0x1c8] sm:$0xff]  ;;  %v640_v33 = vpack.c.bf16 %v313_v32, %v311_v31  ;;  %v315_v26 = vld [vmem:[%s924_s4] sm:$0x3]  ;;  %s793_s4 = smov [#allocation8]  }
  0x5b   :  { %192 = vmatprep.mubr.f32.mxu0 %v792_v0  ;;  %605 = vmatpush1.bf16.msra.mxu1 %v604_v34  ;;  %v634_v25 = vpack.c.bf16 %v310_v23, %v308_v22  ;;  %v112_v34 = vlaneseq  ;;  %s517_s8 = sshll.u32 %s793_s4, 4  ;;  %s518_s8 = int_to_ptr.vmem [resolvable:$true] %s517_s8 }
  0x5c   :  { %607 = vmatprep.subr.bf16.mxu1 %v606_v35  ;;  %s757_s9 = scalar_lea.vmem %s518_s8, 1024  ;;  %p762_p11 = scmp.lt.s32.totalorder %s518_s8, %s518_s8 }
  0x5d   :  { %v877_v35 = vshrl.u32 %v112_v34, 7  ;;  %p758_p10 = scmp.ne.s32.totalorder %s518_s8, %s757_s9  ;;  %p763_p12 = scmp.lt.s32.totalorder %s757_s9, %s757_s9 }
  0x5e   :  { %193 = vmatmul.mubr.f32.gmra.mrb[2].mxu0 %v643_v30 }
  0x5f   :  { %198 = vmatprep.mubr.f32.mxu0 %v792_v0  ;;  %609 = vmatpush1.bf16.msra.mxu1 %v608_v42  ;;  %v114_v36 = vsub.s32 0, %v877_v35  ;;  %p764_p13 = por %p763_p12, %p762_p11 }
  0x60   :  { %611 = vmatprep.subr.bf16.mxu1 %v610_v43 }
  0x61   :  { %v115_v39 = vrot.slane %v110_v37, %v114_v36  ;;  %v320_v27 = vrot.slane %v315_v26, %v114_v36  ;;  %p765_p0 = pnand %p764_p13, %p758_p10 }
  0x62   :  { %199 = vmatmul.mubr.f32.gmra.mrb[4].mxu0 %v644_v38  ;;  %v118_v38 = vsub.s32 1, %v877_v35 }
  0x63   :  { %204 = vmatprep.mubr.f32.mxu0 %v792_v0  ;;  %613 = vmatpush1.bf16.msra.mxu1 %v612_v50 }
  0x64   :  { %615 = vmatprep.subr.bf16.mxu1 %v614_v51  ;;  %v119_v40 = vrot.slane %v110_v37, %v118_v38 }
  0x66   :  { %205 = vmatmul.mubr.f32.gmra.mrb[6].mxu0 %v645_v46 }
  0x67   :  { %210 = vmatprep.mubr.f32.mxu0 %v792_v0  ;;  %617 = vmatpush1.bf16.msra.mxu1 %v616_v58 }
  0x68   :  { %619 = vmatprep.subr.bf16.mxu1 %v618_v59 }
  0x6a   :  { %211 = vmatmul.mubr.f32.gmra.mrb[8].mxu0 %v646_v54 }
  0x6b   :  { %216 = vmatprep.mubr.f32.mxu0 %v792_v0  ;;  %621 = vmatpush1.bf16.msra.mxu1 %v620_v3 }
  0x6c   :  { %623 = vmatprep.subr.bf16.mxu1 %v622_v4 }
  0x6e   :  { %217 = vmatmul.mubr.f32.gmra.mrb[10].mxu0 %v647_v62 }
  0x6f   :  { %222 = vmatprep.mubr.f32.mxu0 %v792_v0  ;;  %625 = vmatpush1.bf16.msra.mxu1 %v624_v11 }
  0x70   :  { %627 = vmatprep.subr.bf16.mxu1 %v626_v12 }
  0x72   :  { %223 = vmatmul.mubr.f32.gmra.mrb[12].mxu0 %v648_v7 }
  0x73   :  { %228 = vmatprep.mubr.f32.mxu0 %v792_v0  ;;  %629 = vmatpush1.bf16.msra.mxu1 %v628_v18  ;;  %v312_v0 = vld [vmem:[#allocation7 + $0x1e8] sm:$0xff] }
  0x74   :  { %631 = vmatprep.subr.bf16.mxu1 %v630_v19  ;;  %v638_v30 = vpack.c.bf16 %v314_v29, %v312_v0 }
  0x76   :  { %229 = vmatmul.mubr.f32.gmra.mrb[14].mxu0 %v649_v15 }
  0x77   :  { %633 = vmatpush1.bf16.msra.mxu1 %v632_v24 }
  0x78   :  { %635 = vmatprep.subr.bf16.mxu1 %v634_v25 }
  0x7b   :  { %637 = vmatpush1.bf16.msra.mxu1 %v636_v28  ;;  %v895_v28 = vrot.slane %v315_v26, %v118_v38 }
  0x7c   :  { %639 = vmatprep.subr.bf16.mxu1 %v638_v30 }
  0x7f   :  { %641 = vmatpush1.bf16.msra.mxu1 %v640_v33 }
 0x12d   :  { %v188_v41 = vpop.f32.mrb[0].mxu0 }
 0x12e   :  { %v189_v42 = vadd.f32 %v188_v41, %v115_v39  ;;  %v190_v43 = vpop.f32.mrb[1].mxu0 }
 0x12f   :  { %v191_v44 = vadd.f32 %v190_v43, %v119_v40 }
 0x130   :  { %v235_v47 = vmax.f32 %v189_v42, 0.0 }
 0x131   :  { %v194_v45 = vpop.f32.mrb[2].mxu0  ;;  %v236_v46 = vmax.f32 %v191_v44, 0.0 }
 0x132   :  { %v195_v48 = vadd.f32 %v194_v45, %v115_v39  ;;  %v196_v49 = vpop.f32.mrb[3].mxu0 }
 0x133   :  { %v197_v50 = vadd.f32 %v196_v49, %v119_v40  ;;  %391 = vmatprep.mubr.f32.mxu1 %v236_v46 }
 0x134   :  { %392 = vmatmul.mubr.f32.vlgmr.msra.gmra.mrb[0].mxu1 %v235_v47  ;;  %v237_v53 = vmax.f32 %v195_v48, 0.0 }
 0x135   :  { %v238_v51 = vmax.f32 %v197_v50, 0.0  ;;  %v200_v52 = vpop.f32.mrb[4].mxu0 }
 0x136   :  { %v201_v54 = vadd.f32 %v200_v52, %v115_v39  ;;  %v202_v55 = vpop.f32.mrb[5].mxu0 }
 0x137   :  { %v203_v56 = vadd.f32 %v202_v55, %v119_v40  ;;  %397 = vmatprep.mubr.f32.mxu1 %v238_v51 }
 0x138   :  { %398 = vmatmul.mubr.f32.gmra.mrb[2].mxu1 %v237_v53  ;;  %v239_v59 = vmax.f32 %v201_v54, 0.0 }
 0x139   :  { %v240_v57 = vmax.f32 %v203_v56, 0.0  ;;  %v206_v58 = vpop.f32.mrb[6].mxu0 }
 0x13a   :  { %v207_v60 = vadd.f32 %v206_v58, %v115_v39  ;;  %v208_v61 = vpop.f32.mrb[7].mxu0 }
 0x13b   :  { %v209_v62 = vadd.f32 %v208_v61, %v119_v40  ;;  %403 = vmatprep.mubr.f32.mxu1 %v240_v57 }
 0x13c   :  { %404 = vmatmul.mubr.f32.gmra.mrb[4].mxu1 %v239_v59  ;;  %v241_v2 = vmax.f32 %v207_v60, 0.0 }
 0x13d   :  { %v242_v63 = vmax.f32 %v209_v62, 0.0  ;;  %v212_v1 = vpop.f32.mrb[8].mxu0 }
 0x13e   :  { %v213_v3 = vadd.f32 %v212_v1, %v115_v39  ;;  %v214_v4 = vpop.f32.mrb[9].mxu0 }
 0x13f   :  { %v215_v5 = vadd.f32 %v214_v4, %v119_v40  ;;  %409 = vmatprep.mubr.f32.mxu1 %v242_v63 }
 0x140   :  { %410 = vmatmul.mubr.f32.gmra.mrb[6].mxu1 %v241_v2  ;;  %v243_v8 = vmax.f32 %v213_v3, 0.0 }
 0x141   :  { %v244_v6 = vmax.f32 %v215_v5, 0.0  ;;  %v218_v7 = vpop.f32.mrb[10].mxu0 }
 0x142   :  { %v219_v9 = vadd.f32 %v218_v7, %v115_v39  ;;  %v220_v10 = vpop.f32.mrb[11].mxu0 }
 0x143   :  { %v221_v11 = vadd.f32 %v220_v10, %v119_v40  ;;  %415 = vmatprep.mubr.f32.mxu1 %v244_v6 }
 0x144   :  { %416 = vmatmul.mubr.f32.gmra.mrb[8].mxu1 %v243_v8  ;;  %v245_v14 = vmax.f32 %v219_v9, 0.0 }
 0x145   :  { %v246_v12 = vmax.f32 %v221_v11, 0.0  ;;  %v224_v13 = vpop.f32.mrb[12].mxu0 }
 0x146   :  { %v225_v15 = vadd.f32 %v224_v13, %v115_v39  ;;  %v226_v16 = vpop.f32.mrb[13].mxu0 }
 0x147   :  { %v227_v17 = vadd.f32 %v226_v16, %v119_v40  ;;  %421 = vmatprep.mubr.f32.mxu1 %v246_v12 }
 0x148   :  { %422 = vmatmul.mubr.f32.gmra.mrb[10].mxu1 %v245_v14  ;;  %v247_v20 = vmax.f32 %v225_v15, 0.0 }
 0x149   :  { %v248_v18 = vmax.f32 %v227_v17, 0.0  ;;  %v230_v19 = vpop.f32.mrb[14].mxu0 }
 0x14a   :  { %v231_v21 = vadd.f32 %v230_v19, %v115_v39  ;;  %v232_v22 = vpop.f32.mrb[15].mxu0 }
 0x14b   :  { %v233_v23 = vadd.f32 %v232_v22, %v119_v40  ;;  %427 = vmatprep.mubr.f32.mxu1 %v248_v18 }
 0x14c   :  { %428 = vmatmul.mubr.f32.gmra.mrb[12].mxu1 %v247_v20  ;;  %v249_v25 = vmax.f32 %v231_v21, 0.0 }
 0x14d   :  { %v250_v24 = vmax.f32 %v233_v23, 0.0 }
 0x14f   :  { %433 = vmatprep.mubr.f32.mxu1 %v250_v24 }
 0x150   :  { %434 = vmatmul.mubr.f32.gmra.mrb[14].mxu1 %v249_v25 }
 0x207   :  { %v393_v0 = vpop.f32.mrb[0].mxu1 }
 0x208   :  { %v394_v29 = vadd.f32 %v393_v0, %v320_v27  ;;  %v395_v30 = vpop.f32.mrb[1].mxu1 }
 0x209   :  { %v396_v31 = vadd.f32 %v395_v30, %v895_v28 }
 0x20a   :  { %659 = vtanh.f32 %v394_v29 }
 0x20b   :  { %661 = vtanh.f32 %v396_v31  ;;  %v399_v32 = vpop.f32.mrb[2].mxu1 }
 0x20c   :  { %v400_v33 = vadd.f32 %v399_v32, %v320_v27  ;;  %v401_v34 = vpop.f32.mrb[3].mxu1 }
 0x20d   :  { %v402_v37 = vadd.f32 %v401_v34, %v895_v28 }
 0x20e   :  { %663 = vtanh.f32 %v400_v33 }
 0x20f   :  { %665 = vtanh.f32 %v402_v37  ;;  %v405_v39 = vpop.f32.mrb[4].mxu1 }
 0x210   :  { %v406_v36 = vadd.f32 %v405_v39, %v320_v27  ;;  %v407_v40 = vpop.f32.mrb[5].mxu1 }
 0x211   :  { %v408_v35 = vadd.f32 %v407_v40, %v895_v28 }
 0x212   :  { %667 = vtanh.f32 %v406_v36 }
 0x213   :  { %669 = vtanh.f32 %v408_v35  ;;  %v411_v38 = vpop.f32.mrb[6].mxu1 }
 0x214   :  { %v660_v41 = vpop.eup %659  ;;  %v412_v42 = vadd.f32 %v411_v38, %v320_v27  ;;  %v413_v43 = vpop.f32.mrb[7].mxu1 }
 0x215   :  { %v662_v44 = vpop.eup %661  ;;  %v414_v45 = vadd.f32 %v413_v43, %v895_v28 }
 0x216   :  { %v538_v46 = vpack.c.bf16 %v662_v44, %v660_v41  ;;  %671 = vtanh.f32 %v412_v42 }
 0x217   :  { %673 = vtanh.f32 %v414_v45  ;;  %v417_v47 = vpop.f32.mrb[8].mxu1 }
 0x218   :  { %v664_v48 = vpop.eup %663  ;;  %504 = vst [vmem:[#allocation8] sm:$0xff] %v538_v46  ;;  %v418_v49 = vadd.f32 %v417_v47, %v320_v27  ;;  %v419_v50 = vpop.f32.mrb[9].mxu1 }
 0x219   :  { %v666_v51 = vpop.eup %665  ;;  %v420_v52 = vadd.f32 %v419_v50, %v895_v28 }
 0x21a   :  { %v539_v53 = vpack.c.bf16 %v666_v51, %v664_v48  ;;  %675 = vtanh.f32 %v418_v49 }
 0x21b   :  { %677 = vtanh.f32 %v420_v52  ;;  %v423_v54 = vpop.f32.mrb[10].mxu1 }
 0x21c   :  { %v668_v55 = vpop.eup %667  ;;  %505 = vst [vmem:[#allocation8 + $0x8] sm:$0xff] %v539_v53  ;;  %v424_v56 = vadd.f32 %v423_v54, %v320_v27  ;;  %v425_v57 = vpop.f32.mrb[11].mxu1 }
 0x21d   :  { %v670_v58 = vpop.eup %669  ;;  %v426_v59 = vadd.f32 %v425_v57, %v895_v28 }
 0x21e   :  { %v540_v60 = vpack.c.bf16 %v670_v58, %v668_v55  ;;  %679 = vtanh.f32 %v424_v56 }
 0x21f   :  { %681 = vtanh.f32 %v426_v59  ;;  %v429_v61 = vpop.f32.mrb[12].mxu1 }
 0x220   :  { %v672_v62 = vpop.eup %671  ;;  %506 = vst [vmem:[#allocation8 + $0x10] sm:$0xff] %v540_v60  ;;  %v430_v63 = vadd.f32 %v429_v61, %v320_v27  ;;  %v431_v1 = vpop.f32.mrb[13].mxu1 }
 0x221   :  { %v674_v2 = vpop.eup %673  ;;  %v432_v3 = vadd.f32 %v431_v1, %v895_v28 }
 0x222   :  { %v541_v4 = vpack.c.bf16 %v674_v2, %v672_v62  ;;  %683 = vtanh.f32 %v430_v63 }
 0x223   :  { %685 = vtanh.f32 %v432_v3  ;;  %v435_v5 = vpop.f32.mrb[14].mxu1 }
 0x224   :  { %v676_v6 = vpop.eup %675  ;;  %507 = vst [vmem:[#allocation8 + $0x18] sm:$0xff] %v541_v4  ;;  %v436_v7 = vadd.f32 %v435_v5, %v320_v27  ;;  %v437_v8 = vpop.f32.mrb[15].mxu1 }
 0x225   :  { %v678_v9 = vpop.eup %677  ;;  %v438_v10 = vadd.f32 %v437_v8, %v895_v28 }
 0x226   :  { %v542_v11 = vpack.c.bf16 %v678_v9, %v676_v6  ;;  %687 = vtanh.f32 %v436_v7 }
 0x227   :  { %689 = vtanh.f32 %v438_v10 }
 0x228   :  { %v680_v12 = vpop.eup %679  ;;  %508 = vst [vmem:[#allocation8 + $0x20] sm:$0xff] %v542_v11 }
 0x229   :  { %v682_v13 = vpop.eup %681 }
 0x22a   :  { %v543_v14 = vpack.c.bf16 %v682_v13, %v680_v12 }
 0x22c   :  { %v684_v15 = vpop.eup %683  ;;  %509 = vst [vmem:[#allocation8 + $0x28] sm:$0xff] %v543_v14 }
 0x22d   :  { %v686_v16 = vpop.eup %685 }
 0x22e   :  { %v544_v17 = vpack.c.bf16 %v686_v16, %v684_v15 }
 0x230   :  { %v688_v18 = vpop.eup %687  ;;  %510 = vst [vmem:[#allocation8 + $0x30] sm:$0xff] %v544_v17 }
 0x231   :  { %v690_v19 = vpop.eup %689 }
 0x232   :  { %v545_v20 = vpack.c.bf16 %v690_v19, %v688_v18 }
 0x234   :  { %511 = vst [vmem:[#allocation8 + $0x38] sm:$0xff] %v545_v20 }
 0x235   :  { %768 = shalt.err (!%p765_p0)
}
 0x236   :  { %s769_s12 = scalar_lea.hbm %s925_s5, 1024 }
 0x237   :  { %p770_p1 = scmp.ne.s32.totalorder %s925_s5, %s769_s12  ;;  %p773_p2 = scmp.lt.u32.totalorder %s769_s12, %s925_s5 }
 0x239   :  { %p775_p3 = pnand %p773_p2, %p770_p1 }
 0x23b   :  { %778 = shalt.err (!%p775_p3)
}
 0x23c   :  { %523 = dma.vmem_to_hbm [thread:$0]  %s518_s8, 1024, %s925_s5, [#allocation4], %s789_s1, %s789_s1, %s790_s17  }
 0x23d   :  { %783 = dma.done.wait [#allocation4], 1024  }
 0x23e   :  { %784 = vsyncadd [#allocation4], 4294966272 }
 0x23f   :  { %527 = vsyncpa [#allocation3], 1 }
 0x240   :  { %528 = vsyncpa [#allocation6], 1 }
 0x241   :  { %529 = vsyncpa [#allocation4], 1 }

</bundles_post_ra>
